<compile_context>
chip_gen: v6e
topology: v6e:2x2x1
jax: 0.10.0
libtpu: 0.0.40
codegen_flags: <defaults>
</compile_context>

<pallas_src>
from functools import partial

import jax
import jax.numpy as jnp
from jax.experimental import pallas as pl
from jax.experimental.pallas import tpu as pltpu


# ----------------------------------------------------------------------------- kernels


def _transform_kernel(adj_ref, uf_ref, uw_ref, h_ref, innorm_ref, *, weight_first):
    """Per source-row tile: out-degree norm + feature transform; accumulate in-degree."""
    i = pl.program_id(0)

    adj = adj_ref[...].astype(jnp.float32)              # (TR, N)  rows = src, cols = dst

    # out-degree of this tile of source nodes: reduce over destinations (lane axis).
    out_deg = jnp.sum(adj, axis=1, keepdims=True)        # (TR, 1)
    out_norm = jax.lax.rsqrt(jnp.maximum(out_deg, 1.0))

    # Scale u_f (N x Fin) instead of h (N x Fout): commutes with the matmul, never wider.
    g = uf_ref[...] * out_norm                            # (TR, Fin_p)
    if weight_first:                                      # Fout <= Fin: transform before agg
        h_ref[...] = jnp.dot(g, uw_ref[...], preferred_element_type=jnp.float32)
    else:                                                 # Fin < Fout: aggregate at Fin width
        h_ref[...] = g

    # in-degree: reduce over sources (sublane axis), accumulated across row tiles in the
    # grid-resident (1, N) output block (same block index every step => stays in VMEM).
    @pl.when(i == 0)
    def _init():
        innorm_ref[...] = jnp.zeros_like(innorm_ref)

    innorm_ref[...] += jnp.sum(adj, axis=0, keepdims=True)

    @pl.when(i == pl.num_programs(0) - 1)
    def _finalize():
        innorm_ref[...] = jax.lax.rsqrt(jnp.maximum(innorm_ref[...], 1.0))


def _aggregate_kernel(adj_ref, h_ref, innorm_ref, uw_ref, out_ref, *,
                      weight_first, activation):
    """Per destination-column tile: rst = in_norm * (A^T @ h) [ @ u_w ] [ activation ]."""
    adj = adj_ref[...].astype(jnp.float32)                # (N, TD)  rows = src, cols = dst tile

    # A^T @ h restricted to this dst tile: contract over src (axis 0 of both operands).
    agg = jax.lax.dot_general(
        adj, h_ref[...],
        dimension_numbers=(((0,), (0,)), ((), ())),
        preferred_element_type=jnp.float32)               # (TD, F_agg_p)

    rst = agg * innorm_ref[...]                            # (TD, 1) destination-side norm

    if not weight_first:                                   # weight applied after aggregation
        rst = jnp.dot(rst, uw_ref[...], preferred_element_type=jnp.float32)

    if activation is not None:
        rst = activation(rst)

    out_ref[...] = rst.astype(out_ref.dtype)


# ----------------------------------------------------------------------------- wrapper


def _round_up(x, m):
    return ((x + m - 1) // m) * m


def _pick_tile(n, requested, lane_multiple):
    """Largest convenient tile dividing n, honoring Mosaic (8, 128) block constraints."""
    if (requested is not None and requested <= n and n % requested == 0
            and requested % lane_multiple == 0):
        return requested
    for cand in (512, 256, 128):
        if n % cand == 0 and cand % lane_multiple == 0:
            return cand
    return n  # full extent (always legal)


def uugcn_layer(adj, u_f, u_w, *, activation=None, row_tile=None, dst_tile=None):
    """adj: (N, N) 0/1 with adj[src, dst]=1; u_f: (N, Fin); u_w: (Fin, Fout).

    weight=False in the original module would simply skip u_w (h = u_f); the weight=True
    branch is what this wrapper implements (the `bias` flag is unused by the reference forward).
    """
    N, in_feats = u_f.shape
    assert adj.shape == (N, N)
    assert u_w.shape[0] == in_feats
    out_feats = u_w.shape[1]

    # Pad feature dims to multiples of 128 -> lane-dense MXU operands and unmasked stores.
    fin_p = _round_up(in_feats, 128)
    fout_p = _round_up(out_feats, 128)
    u_f_p = u_f.astype(jnp.float32)
    if fin_p != in_feats:
        u_f_p = jnp.pad(u_f_p, ((0, 0), (0, fin_p - in_feats)))
    u_w_p = u_w.astype(jnp.float32)
    if (fin_p, fout_p) != (in_feats, out_feats):
        u_w_p = jnp.pad(u_w_p, ((0, fin_p - in_feats), (0, fout_p - out_feats)))

    # Aggregate at the narrower feature width (free algebraic win, identical result).
    weight_first = out_feats <= in_feats
    f_agg = fout_p if weight_first else fin_p

    # 0/1 adjacency is exact in bf16; math is done in fp32 inside the kernels.
    adj_bf16 = adj.astype(jnp.bfloat16)

    tr = _pick_tile(N, row_tile, 8)      # source-row tile   (kernel 1)
    td = _pick_tile(N, dst_tile, 128)    # destination tile  (kernel 2)

    vmem_cap = 48 * 1024 * 1024          # safe on v5e/v6e (128 MiB) and v7x (64 MiB)

    # ---- kernel 1: degrees + feature transform (sequential grid: resident in-deg accumulator)
    h, innorm_row = pl.pallas_call(
        partial(_transform_kernel, weight_first=weight_first),
        out_shape=(
            jax.ShapeDtypeStruct((N, f_agg), jnp.float32),   # h (or out-norm'ed u_f)
            jax.ShapeDtypeStruct((1, N), jnp.float32),       # in_norm (row oriented)
        ),
        grid_spec=pltpu.PrefetchScalarGridSpec(
            num_scalar_prefetch=0,
            grid=(N // tr,),
            in_specs=[
                pl.BlockSpec((tr, N), lambda i: (i, 0)),          # adjacency row tile (bf16)
                pl.BlockSpec((tr, fin_p), lambda i: (i, 0)),      # u_f row tile
                pl.BlockSpec((fin_p, fout_p), lambda i: (0, 0)),  # u_w (resident)
            ],
            out_specs=[
                pl.BlockSpec((tr, f_agg), lambda i: (i, 0)),
                pl.BlockSpec((1, N), lambda i: (0, 0)),           # resident accumulator
            ],
        ),
        compiler_params=pltpu.CompilerParams(
            dimension_semantics=("arbitrary",),
            vmem_limit_bytes=vmem_cap),
    )(adj_bf16, u_f_p, u_w_p)

    # Cheap O(N) relayout in the wrapper (lanes -> sublanes) so the kernel needs no transpose.
    innorm_col = innorm_row.reshape(N, 1)

    # ---- kernel 2: aggregation over destination tiles ("parallel" -> megacore-splittable)
    out_p = pl.pallas_call(
        partial(_aggregate_kernel, weight_first=weight_first, activation=activation),
        out_shape=jax.ShapeDtypeStruct((N, fout_p), jnp.float32),
        grid_spec=pltpu.PrefetchScalarGridSpec(
            num_scalar_prefetch=0,
            grid=(N // td,),
            in_specs=[
                pl.BlockSpec((N, td), lambda i: (0, i)),          # adjacency column slab (bf16)
                pl.BlockSpec((N, f_agg), lambda i: (0, 0)),       # h fully resident in VMEM
                pl.BlockSpec((td, 1), lambda i: (i, 0)),          # in_norm column tile
                pl.BlockSpec((fin_p, fout_p), lambda i: (0, 0)),  # u_w (used iff Fin < Fout)
            ],
            out_specs=pl.BlockSpec((td, fout_p), lambda i: (i, 0)),
        ),
        compiler_params=pltpu.CompilerParams(
            dimension_semantics=("parallel",),
            vmem_limit_bytes=vmem_cap),
    )(adj_bf16, h, innorm_col, u_w_p)

    return out_p if fout_p == out_feats else out_p[:, :out_feats]


# ----------------------------------------------------------------------------- test harness


def _xavier_uniform(key, shape):
    fan_in, fan_out = shape
    bound = (6.0 / (fan_in + fan_out)) ** 0.5
    return jax.random.uniform(key, shape, jnp.float32, -bound, bound)


def _reference(adj, u_f, u_w):
    hi = jax.lax.Precision.HIGHEST
    h = jnp.dot(u_f, u_w, precision=hi)
    out_deg = jnp.maximum(jnp.sum(adj, axis=1), 1.0)
    in_deg = jnp.maximum(jnp.sum(adj, axis=0), 1.0)
    h = h * (out_deg ** -0.5)[:, None]
    rst = jnp.dot(adj.T, h, precision=hi)
    rst = rst * (in_deg ** -0.5)[:, None]
    return rst


if __name__ == "__main__":
    key = jax.random.PRNGKey(0)
    k1, k2, k3, k4, k5, k6 = jax.random.split(key, 6)

    # Case 1: Fout == Fin (weight applied before aggregation); N below 128 -> full-block path.
    N1, FI1, FO1 = 64, 32, 32
    adj1 = (jax.random.uniform(k1, (N1, N1)) < 0.1).astype(jnp.float32)
    uf1 = jax.random.normal(k2, (N1, FI1), jnp.float32)
    uw1 = _xavier_uniform(k3, (FI1, FO1))
    out1 = jax.block_until_ready(uugcn_layer(adj1, uf1, uw1))
    ref1 = _reference(adj1, uf1, uw1)
    assert out1.shape == (N1, FO1)
    assert jnp.allclose(out1, ref1, atol=1e-3, rtol=1e-3), float(jnp.max(jnp.abs(out1 - ref1)))

    # Case 2: Fin < Fout (weight applied after aggregation) with real multi-tile grids.
    N2, FI2, FO2 = 256, 16, 48
    adj2 = (jax.random.uniform(k4, (N2, N2)) < 0.05).astype(jnp.float32)
    uf2 = jax.random.normal(k5, (N2, FI2), jnp.float32)
    uw2 = _xavier_uniform(k6, (FI2, FO2))
    out2 = jax.block_until_ready(
        uugcn_layer(adj2, uf2, uw2, row_tile=128, dst_tile=128))
    ref2 = _reference(adj2, uf2, uw2)
    assert out2.shape == (N2, FO2)
    assert jnp.allclose(out2, ref2, atol=1e-3, rtol=1e-3), float(jnp.max(jnp.abs(out2 - ref2)))

    print("KERNEL_OK")
</pallas_src>

<mosaic_0001>
module attributes {stable_mosaic.version = 11 : i64} {
  func.func @_transform_kernel(%arg0: i32, %arg1: memref<64x64xbf16, #tpu.memory_space<vmem>>, %arg2: memref<64x128xf32, #tpu.memory_space<vmem>>, %arg3: memref<128x128xf32, #tpu.memory_space<vmem>>, %arg4: memref<64x128xf32, #tpu.memory_space<vmem>>, %arg5: memref<1x64xf32, #tpu.memory_space<vmem>>) attributes {dimension_semantics = [#tpu.dimension_semantics<arbitrary>], iteration_bounds = array<i64: 1>, scalar_prefetch = 0 : i64, scratch_operands = 0 : i64, tpu.core_type = #tpu.core_type<tc>, window_params = [{transform_indices = @transform_0, window_bounds = array<i64: 64, 64>}, {transform_indices = @transform_1, window_bounds = array<i64: 64, 128>}, {pipeline_mode = #tpu.pipeline_mode<synchronous>, transform_indices = @transform_2, window_bounds = array<i64: 128, 128>}, {transform_indices = @transform_3, window_bounds = array<i64: 64, 128>}, {pipeline_mode = #tpu.pipeline_mode<synchronous>, transform_indices = @transform_4, window_bounds = array<i64: 1, 64>}]} {
    %c0 = arith.constant 0 : index
    %c0_0 = arith.constant 0 : index
    %0 = vector.load %arg1[%c0, %c0_0] : memref<64x64xbf16, #tpu.memory_space<vmem>>, vector<64x64xbf16>
    %1 = arith.extf %0 : vector<64x64xbf16> to vector<64x64xf32>
    %cst = arith.constant dense<0.000000e+00> : vector<64xf32>
    %2 = vector.multi_reduction <add>, %1, %cst [1] : vector<64x64xf32> to vector<64xf32>
    %3 = vector.shape_cast %2 : vector<64xf32> to vector<64x1xf32>
    %cst_1 = arith.constant 1.000000e+00 : f32
    %4 = vector.broadcast %cst_1 : f32 to vector<64x1xf32>
    %5 = arith.maximumf %3, %4 : vector<64x1xf32>
    %6 = math.rsqrt %5 : vector<64x1xf32>
    %c0_2 = arith.constant 0 : index
    %c0_3 = arith.constant 0 : index
    %7 = vector.load %arg2[%c0_2, %c0_3] : memref<64x128xf32, #tpu.memory_space<vmem>>, vector<64x128xf32>
    %8 = vector.broadcast %6 : vector<64x1xf32> to vector<64x128xf32>
    %9 = arith.mulf %7, %8 : vector<64x128xf32>
    %c0_4 = arith.constant 0 : index
    %c0_5 = arith.constant 0 : index
    %10 = vector.load %arg3[%c0_4, %c0_5] : memref<128x128xf32, #tpu.memory_space<vmem>>, vector<128x128xf32>
    %cst_6 = arith.constant dense<0.000000e+00> : vector<64x128xf32>
    %11 = tpu.matmul %9, %10, %cst_6 {dimension_numbers = #tpu.dot_dimension_numbers<[1], [0], [0], [1], [0, 0, 1, 1], [], []>} : vector<64x128xf32>, vector<128x128xf32>, vector<64x128xf32> -> vector<64x128xf32>
    %c0_7 = arith.constant 0 : index
    %c0_8 = arith.constant 0 : index
    %12 = vector.load %arg4[%c0_7, %c0_8] : memref<64x128xf32, #tpu.memory_space<vmem>>, vector<64x128xf32>
    tpu.vector_store %arg4[%c0_7, %c0_8], %11 {strides = array<i32>} : memref<64x128xf32, #tpu.memory_space<vmem>>, vector<64x128xf32>,
    %c0_i32 = arith.constant 0 : i32
    %13 = arith.cmpi eq, %arg0, %c0_i32 : i32
    %14 = arith.extui %13 : i1 to i32
    %c0_i32_9 = arith.constant 0 : i32
    %15 = arith.cmpi ne, %14, %c0_i32_9 : i32
    scf.if %15 {
      %cst_17 = arith.constant 0.000000e+00 : f32
      %24 = vector.broadcast %cst_17 : f32 to vector<1x64xf32>
      %c0_18 = arith.constant 0 : index
      %c0_19 = arith.constant 0 : index
      %25 = vector.load %arg5[%c0_18, %c0_19] : memref<1x64xf32, #tpu.memory_space<vmem>>, vector<1x64xf32>
      tpu.vector_store %arg5[%c0_18, %c0_19], %24 {strides = array<i32>} : memref<1x64xf32, #tpu.memory_space<vmem>>, vector<1x64xf32>,
    } else {
    }
    %c0_10 = arith.constant 0 : index
    %c0_11 = arith.constant 0 : index
    %16 = vector.load %arg5[%c0_10, %c0_11] : memref<1x64xf32, #tpu.memory_space<vmem>>, vector<1x64xf32>
    %cst_12 = arith.constant dense<0.000000e+00> : vector<64xf32>
    %17 = vector.multi_reduction <add>, %1, %cst_12 [0] : vector<64x64xf32> to vector<64xf32>
    %18 = vector.shape_cast %17 : vector<64xf32> to vector<1x64xf32>
    %19 = arith.addf %16, %18 : vector<1x64xf32>
    %c0_13 = arith.constant 0 : index
    %c0_14 = arith.constant 0 : index
    %20 = vector.load %arg5[%c0_13, %c0_14] : memref<1x64xf32, #tpu.memory_space<vmem>>, vector<1x64xf32>
    tpu.vector_store %arg5[%c0_13, %c0_14], %19 {strides = array<i32>} : memref<1x64xf32, #tpu.memory_space<vmem>>, vector<1x64xf32>,
    %c0_i32_15 = arith.constant 0 : i32
    %21 = arith.cmpi eq, %arg0, %c0_i32_15 : i32
    %22 = arith.extui %21 : i1 to i32
    %c0_i32_16 = arith.constant 0 : i32
    %23 = arith.cmpi ne, %22, %c0_i32_16 : i32
    scf.if %23 {
      %c0_17 = arith.constant 0 : index
      %c0_18 = arith.constant 0 : index
      %24 = vector.load %arg5[%c0_17, %c0_18] : memref<1x64xf32, #tpu.memory_space<vmem>>, vector<1x64xf32>
      %cst_19 = arith.constant 1.000000e+00 : f32
      %25 = vector.broadcast %cst_19 : f32 to vector<1x64xf32>
      %26 = arith.maximumf %24, %25 : vector<1x64xf32>
      %27 = math.rsqrt %26 : vector<1x64xf32>
      %c0_20 = arith.constant 0 : index
      %c0_21 = arith.constant 0 : index
      %28 = vector.load %arg5[%c0_20, %c0_21] : memref<1x64xf32, #tpu.memory_space<vmem>>, vector<1x64xf32>
      tpu.vector_store %arg5[%c0_20, %c0_21], %27 {strides = array<i32>} : memref<1x64xf32, #tpu.memory_space<vmem>>, vector<1x64xf32>,
    } else {
    }
    return
  }
  func.func @transform_0(%arg0: i32) -> (i32, i32) {
    %c0_i32 = arith.constant 0 : i32
    %c0_i32_0 = arith.constant 0 : i32
    return %arg0, %c0_i32 : i32, i32
  }
  func.func @transform_1(%arg0: i32) -> (i32, i32) {
    %c0_i32 = arith.constant 0 : i32
    %c0_i32_0 = arith.constant 0 : i32
    return %arg0, %c0_i32 : i32, i32
  }
  func.func @transform_2(%arg0: i32) -> (i32, i32) {
    %c0_i32 = arith.constant 0 : i32
    %c0_i32_0 = arith.constant 0 : i32
    %c0_i32_1 = arith.constant 0 : i32
    return %c0_i32, %c0_i32_0 : i32, i32
  }
  func.func @transform_3(%arg0: i32) -> (i32, i32) {
    %c0_i32 = arith.constant 0 : i32
    %c0_i32_0 = arith.constant 0 : i32
    return %arg0, %c0_i32 : i32, i32
  }
  func.func @transform_4(%arg0: i32) -> (i32, i32) {
    %c0_i32 = arith.constant 0 : i32
    %c0_i32_0 = arith.constant 0 : i32
    %c0_i32_1 = arith.constant 0 : i32
    return %c0_i32, %c0_i32_0 : i32, i32
  }
}

</mosaic_0001>

<bundles_post_ra>
// kernel: tpu_custom_call.1
= control target key start
LH: loop header
LB: loop body
LE: loop exit
PB: predicated region body
PF: predicated region fallthrough
CT: control target
= control target key end

     0   :  { %10 = vsyncpa [#allocation3], 0  ;;  %s648_s0 = inlined_call_operand.hbm [shape: bf16[64,64], index: 0, kind: input, shape index: {}]   ;;  %s649_s1 = inlined_call_operand.hbm [shape: f32[64,128], index: 1, kind: input, shape index: {}]   ;;  %s650_s2 = inlined_call_operand.hbm [shape: f32[128,128], index: 2, kind: input, shape index: {}]   ;;  %s651_s3 = inlined_call_operand.hbm [shape: f32[64,128], index: 3, kind: output, shape index: {0}]   ;;  %s652_s4 = inlined_call_operand.hbm [shape: f32[1,64], index: 4, kind: output, shape index: {1}]  }
   0x1   :  { %11 = vsyncpa [#allocation6], 0 }
   0x2   :  { %12 = vsyncpa [#allocation4], 0 }
   0x3   :  { %13 = vsyncpa [#allocation10], 0  ;;  %s578_s15 = smov [#allocation5]  }
   0x4   :  { %s31_s16 = sshll.u32 %s578_s15, 4  ;;  %s32_s16 = int_to_ptr.vmem [resolvable:$true] %s31_s16 }
   0x5   :  { %s478_s17 = scalar_lea.vmem %s32_s16, 1024  ;;  %p483_p1 = scmp.lt.s32.totalorder %s32_s16, %s32_s16 }
   0x6   :  { %p479_p0 = scmp.ne.s32.totalorder %s32_s16, %s478_s17  ;;  %p484_p2 = scmp.lt.s32.totalorder %s478_s17, %s478_s17 }
   0x8   :  { %p485_p3 = por %p484_p2, %p483_p1 }
   0xa   :  { %p486_p4 = pnand %p485_p3, %p479_p0 }
   0xc   :  { %489 = shalt.err (!%p486_p4)
}
   0xd   :  { %s579_s18 = smov 128   ;;  %s580_s19 = smov 8  }
   0xe   :  { %37 = dma.hbm_to_vmem [thread:$0]  %s649_s1, 1024, %s32_s16, [#allocation6], %s579_s18, %s579_s18, %s580_s19  }
   0xf   :  { %s581_s22 = smov [#allocation2]  }
  0x10   :  { %s19_s23 = sshll.u32 %s581_s22, 4  ;;  %s20_s23 = int_to_ptr.vmem [resolvable:$true] %s19_s23 }
  0x11   :  { %s498_s24 = scalar_lea.vmem %s20_s23, 512  ;;  %p503_p6 = scmp.lt.s32.totalorder %s20_s23, %s20_s23 }
  0x12   :  { %p499_p5 = scmp.ne.s32.totalorder %s20_s23, %s498_s24  ;;  %p504_p7 = scmp.lt.s32.totalorder %s498_s24, %s498_s24 }
  0x14   :  { %p505_p8 = por %p504_p7, %p503_p6 }
  0x16   :  { %p506_p9 = pnand %p505_p8, %p499_p5 }
  0x18   :  { %509 = shalt.err (!%p506_p9)
}
  0x19   :  { %s582_s25 = smov 64   ;;  %s583_s26 = smov 4  }
  0x1a   :  { %25 = dma.hbm_to_vmem [thread:$0]  %s648_s0, 512, %s20_s23, [#allocation3], %s582_s25, %s582_s25, %s583_s26  }
  0x1b   :  { %s584_s29 = smov [#allocation7]  }
  0x1c   :  { %s43_s30 = sshll.u32 %s584_s29, 4  ;;  %s44_s30 = int_to_ptr.vmem [resolvable:$true] %s43_s30 }
  0x1d   :  { %s518_s1 = scalar_lea.vmem %s44_s30, 2048  ;;  %p523_p11 = scmp.lt.s32.totalorder %s44_s30, %s44_s30 }
  0x1e   :  { %p519_p10 = scmp.ne.s32.totalorder %s44_s30, %s518_s1  ;;  %p524_p12 = scmp.lt.s32.totalorder %s518_s1, %s518_s1 }
  0x20   :  { %p525_p13 = por %p524_p12, %p523_p11 }
  0x22   :  { %p526_p0 = pnand %p525_p13, %p519_p10 }
  0x24   :  { %529 = shalt.err (!%p526_p0)
}
  0x25   :  { %49 = dma.hbm_to_vmem [thread:$0]  %s650_s2, 2048, %s44_s30, [#allocation6], %s579_s18, %s579_s18, %s580_s19  }
  0x26   :  { %570 = dma.done.wait [#allocation3], 512  }
  0x27   :  { %571 = vsyncadd [#allocation3], 4294966784 }
  0x28   :  { %572 = dma.done.wait [#allocation6], 3072  }
  0x29   :  { %573 = vsyncadd [#allocation6], 4294964224  ;;  %vm265_vm0 = vcmask 516096   ;;  %v585_v0 = vmov 0.0   ;;  %v324_v1 = vld [vmem:[#allocation2] sm:$0xff]   ;;  %vm75_vm1 = vcmask 523264  }
  0x2a   :  { %266 = vst.msk [vmem:[#allocation9] sm:$0x1] %vm265_vm0, %v585_v0  ;;  %v340_v2 = vld [vmem:[#allocation2 + $0x10] sm:$0xff]   ;;  %v326_v3 = vunpack.c.h.bf16 %v324_v1  ;;  %v325_v4 = vunpack.c.l.bf16 %v324_v1  ;;  %v339_v7 = vld [vmem:[#allocation2 + $0x8] sm:$0xff]   ;;  %v147_v8 = vld [vmem:[#allocation7 + $0x78] sm:$0xff]  ;;  %s586_s0 = smov [#allocation9]  }
  0x2b   :  { %v334_v5 = vunpack.c.h.bf16 %v340_v2  ;;  %v333_v6 = vunpack.c.l.bf16 %v340_v2  ;;  %v341_v9 = vld [vmem:[#allocation2 + $0x18] sm:$0xff]   ;;  %v329_v10 = vunpack.c.l.bf16 %v339_v7  ;;  %366 = vmatprep.subr.mxu0 %v147_v8  ;;  %v146_v11 = vld [vmem:[#allocation7 + $0x70] sm:$0xff]  ;;  %410 = vmatprep.subr.mxu1 %v147_v8  ;;  %v330_v14 = vunpack.c.h.bf16 %v339_v7  ;;  %v145_v16 = vld [vmem:[#allocation7 + $0x68] sm:$0xff]  ;;  %s309_s2 = sshll.u32 %s586_s0, 4  ;;  %s310_s2 = int_to_ptr.vmem [resolvable:$true] %s309_s2 }
  0x2c   :  { %v79_v12 = vsel %vm75_vm1, %v326_v3, 0.0  ;;  %v76_v13 = vsel %vm75_vm1, %v325_v4, 0.0  ;;  %367 = vmatpush3.msra.mxu0 %v147_v8  ;;  %426 = vmatpush3.msra.mxu1 %v147_v8  ;;  %v337_v19 = vunpack.c.l.bf16 %v341_v9  ;;  %v144_v23 = vld [vmem:[#allocation7 + $0x60] sm:$0xff]  ;;  %v338_v26 = vunpack.c.h.bf16 %v341_v9  ;;  %v143_v28 = vld [vmem:[#allocation7 + $0x58] sm:$0xff]  ;;  %v142_v30 = vld [vmem:[#allocation7 + $0x50] sm:$0xff]  ;;  %s530_s7 = scalar_lea.vmem %s310_s2, 16  ;;  %p535_p2 = scmp.lt.s32.totalorder %s310_s2, %s310_s2 }
  0x2d   :  { %80 = vadd.xlane.f32.xlu1 %v79_v12  ;;  %77 = vadd.xlane.f32.xlu0 %v76_v13  ;;  %v268_v15 = vadd.f32 %v79_v12, %v76_v13  ;;  %v91_v17 = vsel %vm75_vm1, %v334_v5, 0.0  ;;  %v88_v18 = vsel %vm75_vm1, %v333_v6, 0.0  ;;  %v82_v20 = vsel %vm75_vm1, %v329_v10, 0.0  ;;  %v141_v33 = vld [vmem:[#allocation7 + $0x48] sm:$0xff]  ;;  %v140_v35 = vld [vmem:[#allocation7 + $0x40] sm:$0xff]  ;;  %v139_v37 = vld [vmem:[#allocation7 + $0x38] sm:$0xff]  ;;  %p531_p1 = scmp.ne.s32.totalorder %s310_s2, %s530_s7 }
  0x2e   :  { %368 = vmatprep.subr.mxu0 %v146_v11  ;;  %411 = vmatprep.subr.mxu1 %v146_v11  ;;  %v85_v22 = vsel %vm75_vm1, %v330_v14, 0.0  ;;  %v94_v25 = vsel %vm75_vm1, %v337_v19, 0.0  ;;  %v97_v31 = vsel %vm75_vm1, %v338_v26, 0.0  ;;  %v138_v39 = vld [vmem:[#allocation7 + $0x30] sm:$0xff]  ;;  %v137_v41 = vld [vmem:[#allocation7 + $0x28] sm:$0xff]  ;;  %v136_v43 = vld [vmem:[#allocation7 + $0x20] sm:$0xff] }
  0x2f   :  { %v269_v21 = vadd.f32 %v268_v15, %v82_v20  ;;  %369 = vmatpush3.msra.mxu0 %v146_v11  ;;  %427 = vmatpush3.msra.mxu1 %v146_v11  ;;  %v135_v46 = vld [vmem:[#allocation7 + $0x18] sm:$0xff]  ;;  %v134_v48 = vld [vmem:[#allocation7 + $0x10] sm:$0xff]  ;;  %v133_v50 = vld [vmem:[#allocation7 + $0x8] sm:$0xff]  ;;  %s534_s8 = scalar_lea.vmem %s310_s2, 32 }
  0x30   :  { %370 = vmatprep.subr.mxu0 %v145_v16  ;;  %412 = vmatprep.subr.mxu1 %v145_v16  ;;  %v132_v51 = vld [vmem:[#allocation7] sm:$0xff]  ;;  %v117_v4 = vld [vmem:[#allocation5 + $0x8] sm:$0xff]  ;;  %p536_p3 = scmp.lt.s32.totalorder %s534_s8, %s530_s7 }
  0x31   :  { %92 = vadd.xlane.f32.xlu1 %v91_v17  ;;  %89 = vadd.xlane.f32.xlu0 %v88_v18  ;;  %v270_v24 = vadd.f32 %v269_v21, %v85_v22  ;;  %v267_v45 = vld [vmem:[#allocation9] sm:$0x1]  ;;  %v121_v10 = vld [vmem:[#allocation5 + $0x28] sm:$0xff] }
  0x32   :  { %371 = vmatpush3.msra.mxu0 %v145_v16  ;;  %428 = vmatpush3.msra.mxu1 %v145_v16  ;;  %v116_v5 = vld [vmem:[#allocation5] sm:$0xff]  ;;  %v122_v16 = vld [vmem:[#allocation5 + $0x30] sm:$0xff]  ;;  %p537_p4 = por %p536_p3, %p535_p2 }
  0x33   :  { %v271_v27 = vadd.f32 %v270_v24, %v88_v18  ;;  %372 = vmatprep.subr.mxu0 %v144_v23  ;;  %413 = vmatprep.subr.mxu1 %v144_v23  ;;  %v120_v11 = vld [vmem:[#allocation5 + $0x20] sm:$0xff] }
  0x34   :  { %373 = vmatpush3.msra.mxu0 %v144_v23  ;;  %429 = vmatpush3.msra.mxu1 %v144_v23  ;;  %v119_v23 = vld [vmem:[#allocation5 + $0x18] sm:$0xff]  ;;  %p538_p5 = pnand %p537_p4, %p531_p1 }
  0x35   :  { %95 = vadd.xlane.f32.xlu1 %v94_v25  ;;  %83 = vadd.xlane.f32.xlu0 %v82_v20  ;;  %v272_v29 = vadd.f32 %v271_v27, %v91_v17  ;;  %v118_v17 = vld [vmem:[#allocation5 + $0x10] sm:$0xff] }
  0x36   :  { %374 = vmatprep.subr.mxu0 %v143_v28  ;;  %414 = vmatprep.subr.mxu1 %v143_v28 }
  0x37   :  { %v273_v32 = vadd.f32 %v272_v29, %v94_v25  ;;  %375 = vmatpush3.msra.mxu0 %v143_v28  ;;  %430 = vmatpush3.msra.mxu1 %v143_v28 }
  0x38   :  { %376 = vmatprep.subr.mxu0 %v142_v30  ;;  %415 = vmatprep.subr.mxu1 %v142_v30 }
  0x39   :  { %98 = vadd.xlane.f32.xlu1 %v97_v31  ;;  %86 = vadd.xlane.f32.xlu0 %v85_v22  ;;  %v274_v34 = vadd.f32 %v273_v32, %v97_v31  ;;  %v123_v22 = vld [vmem:[#allocation5 + $0x38] sm:$0xff] }
  0x3a   :  { %377 = vmatpush3.msra.mxu0 %v142_v30  ;;  %431 = vmatpush3.msra.mxu1 %v142_v30 }
  0x3b   :  { %v275_v36 = vrot.slane %v274_v34, 4  ;;  %378 = vmatprep.subr.mxu0 %v141_v33  ;;  %416 = vmatprep.subr.mxu1 %v141_v33 }
  0x3c   :  { %379 = vmatpush3.msra.mxu0 %v141_v33  ;;  %432 = vmatpush3.msra.mxu1 %v141_v33 }
  0x3d   :  { %v276_v38 = vadd.f32 %v275_v36, %v274_v34  ;;  %380 = vmatprep.subr.mxu0 %v140_v35  ;;  %417 = vmatprep.subr.mxu1 %v140_v35 }
  0x3e   :  { %381 = vmatpush3.msra.mxu0 %v140_v35  ;;  %433 = vmatpush3.msra.mxu1 %v140_v35 }
  0x3f   :  { %v277_v40 = vrot.slane %v276_v38, 2  ;;  %382 = vmatprep.subr.mxu0 %v139_v37  ;;  %418 = vmatprep.subr.mxu1 %v139_v37 }
  0x40   :  { %383 = vmatpush3.msra.mxu0 %v139_v37  ;;  %434 = vmatpush3.msra.mxu1 %v139_v37 }
  0x41   :  { %v278_v42 = vadd.f32 %v277_v40, %v276_v38  ;;  %384 = vmatprep.subr.mxu0 %v138_v39  ;;  %419 = vmatprep.subr.mxu1 %v138_v39 }
  0x42   :  { %385 = vmatpush3.msra.mxu0 %v138_v39  ;;  %435 = vmatpush3.msra.mxu1 %v138_v39 }
  0x43   :  { %v279_v44 = vrot.slane %v278_v42, 1  ;;  %386 = vmatprep.subr.mxu0 %v137_v41  ;;  %420 = vmatprep.subr.mxu1 %v137_v41 }
  0x44   :  { %387 = vmatpush3.msra.mxu0 %v137_v41  ;;  %436 = vmatpush3.msra.mxu1 %v137_v41 }
  0x45   :  { %v280_v47 = vadd.f32 %v279_v44, %v278_v42  ;;  %388 = vmatprep.subr.mxu0 %v136_v43  ;;  %421 = vmatprep.subr.mxu1 %v136_v43 }
  0x46   :  { %389 = vmatpush3.msra.mxu0 %v136_v43  ;;  %437 = vmatpush3.msra.mxu1 %v136_v43 }
  0x47   :  { %v281_v49 = vadd.f32 %v280_v47, %v267_v45  ;;  %390 = vmatprep.subr.mxu0 %v135_v46  ;;  %422 = vmatprep.subr.mxu1 %v135_v46 }
  0x48   :  { %391 = vmatpush3.msra.mxu0 %v135_v46  ;;  %438 = vmatpush3.msra.mxu1 %v135_v46 }
  0x49   :  { %283 = vst.msk [vmem:[#allocation9] sm:$0x1] %vm265_vm0, %v281_v49  ;;  %392 = vmatprep.subr.mxu0 %v134_v48  ;;  %423 = vmatprep.subr.mxu1 %v134_v48 }
  0x4a   :  { %393 = vmatpush3.msra.mxu0 %v134_v48  ;;  %439 = vmatpush3.msra.mxu1 %v134_v48 }
  0x4b   :  { %394 = vmatprep.subr.mxu0 %v133_v50  ;;  %424 = vmatprep.subr.mxu1 %v133_v50 }
  0x4c   :  { %395 = vmatpush3.msra.mxu0 %v133_v50  ;;  %440 = vmatpush3.msra.mxu1 %v133_v50 }
  0x4d   :  { %396 = vmatprep.subr.mxu0 %v132_v51  ;;  %425 = vmatprep.subr.mxu1 %v132_v51 }
  0x4e   :  { %397 = vmatpush3.msra.mxu0 %v132_v51  ;;  %441 = vmatpush3.msra.mxu1 %v132_v51 }
  0x50   :  { %v287_v28 = vld [vmem:[#allocation9] sm:$0x1] }
  0x51   :  { %v288_v29 = vmax.f32 %v287_v28, 1.0 }
  0xb6   :  { %v81_v52 = vpop.xlane.xlu1 %80  ;;  %v78_v53 = vpop.xlane.xlu0 %77 }
  0xb7   :  { %v101_v54 = vmax.f32 %v81_v52, 1.0  ;;  %v100_v55 = vmax.f32 %v78_v53, 1.0 }
  0xb9   :  { %452 = vrsqrt.f32 %v101_v54 }
  0xba   :  { %454 = vrsqrt.f32 %v100_v55  ;;  %v93_v56 = vpop.xlane.xlu1 %92  ;;  %v90_v57 = vpop.xlane.xlu0 %89 }
  0xbb   :  { %v105_v58 = vmax.f32 %v93_v56, 1.0  ;;  %v104_v59 = vmax.f32 %v90_v57, 1.0 }
  0xbd   :  { %456 = vrsqrt.f32 %v105_v58 }
  0xbe   :  { %458 = vrsqrt.f32 %v104_v59  ;;  %v96_v60 = vpop.xlane.xlu1 %95  ;;  %v84_v61 = vpop.xlane.xlu0 %83 }
  0xbf   :  { %v106_v62 = vmax.f32 %v96_v60, 1.0  ;;  %v102_v63 = vmax.f32 %v84_v61, 1.0 }
  0xc1   :  { %460 = vrsqrt.f32 %v106_v62 }
  0xc2   :  { %462 = vrsqrt.f32 %v102_v63  ;;  %v99_v0 = vpop.xlane.xlu1 %98  ;;  %v87_v1 = vpop.xlane.xlu0 %86 }
  0xc3   :  { %v107_v2 = vmax.f32 %v99_v0, 1.0  ;;  %v103_v3 = vmax.f32 %v87_v1, 1.0 }
  0xc5   :  { %464 = vrsqrt.f32 %v107_v2 }
  0xc6   :  { %v453_v6 = vpop.eup %452  ;;  %466 = vrsqrt.f32 %v103_v3 }
  0xc7   :  { %v455_v7 = vpop.eup %454  ;;  %v125_v8 = vmul.f32 %v453_v6, %v117_v4  ;;  %468 = vrsqrt.f32 %v288_v29 }
  0xc8   :  { %v124_v9 = vmul.f32 %v455_v7, %v116_v5 }
  0xca   :  { %v457_v12 = vpop.eup %456  ;;  %398 = vmatprep.mubr.f32.mxu0 %v124_v9 }
  0xcb   :  { %v459_v13 = vpop.eup %458  ;;  %399 = vmatmul.mubr.f32.vlgmr.msra.gmra.mxu0 %v125_v8  ;;  %v129_v14 = vmul.f32 %v457_v12, %v121_v10 }
  0xcc   :  { %v128_v15 = vmul.f32 %v459_v13, %v120_v11 }
  0xce   :  { %v461_v18 = vpop.eup %460  ;;  %404 = vmatprep.mubr.f32.mxu1 %v128_v15 }
  0xcf   :  { %v463_v19 = vpop.eup %462  ;;  %405 = vmatmul.mubr.f32.vlgmr.msra.gmra.mxu1 %v129_v14  ;;  %v130_v20 = vmul.f32 %v461_v18, %v122_v16 }
  0xd0   :  { %v126_v21 = vmul.f32 %v463_v19, %v118_v17 }
  0xd1   :  { %407 = vmatprep.mubr.f32.mxu1 %v130_v20 }
  0xd2   :  { %v465_v24 = vpop.eup %464  ;;  %401 = vmatprep.mubr.f32.mxu0 %v126_v21 }
  0xd3   :  { %v467_v25 = vpop.eup %466  ;;  %v131_v26 = vmul.f32 %v465_v24, %v123_v22 }
  0xd4   :  { %v127_v27 = vmul.f32 %v467_v25, %v119_v23  ;;  %v469_v30 = vpop.eup %468 }
  0xd5   :  { %408 = vmatmul.mubr.f32.gmra.mxu1 %v131_v26  ;;  %290 = vst.msk [vmem:[#allocation9] sm:$0x1] %vm265_vm0, %v469_v30 }
  0xd6   :  { %402 = vmatmul.mubr.f32.gmra.mxu0 %v127_v27 }
  0xd7   :  { %541 = shalt.err (!%p538_p5)
}
  0xd8   :  { %312 = dma.vmem_to_hbm [thread:$0]  %s310_s2, 16, %s652_s4, [#allocation10]  }
  0xd9   :  { %s587_s11 = smov [#allocation8]  }
  0xda   :  { %s296_s12 = sshll.u32 %s587_s11, 4  ;;  %s297_s12 = int_to_ptr.vmem [resolvable:$true] %s296_s12 }
  0xdb   :  { %s550_s4 = scalar_lea.vmem %s297_s12, 1024  ;;  %p555_p7 = scmp.lt.s32.totalorder %s297_s12, %s297_s12 }
  0xdc   :  { %p551_p6 = scmp.ne.s32.totalorder %s297_s12, %s550_s4  ;;  %p556_p8 = scmp.lt.s32.totalorder %s550_s4, %s550_s4 }
  0xde   :  { %p557_p9 = por %p556_p8, %p555_p7 }
  0xe0   :  { %p558_p10 = pnand %p557_p9, %p551_p6 }
 0x18b   :  { %v400_v31 = vpop.f32.mrf.mxu0 }
 0x18c   :  { %254 = vst [vmem:[#allocation8 + $0x8] sm:$0xff] %v400_v31 }
 0x18d   :  { %v214_v32 = vpop.f32.mrf.mxu0 }
 0x18e   :  { %253 = vst [vmem:[#allocation8] sm:$0xff] %v214_v32 }
 0x18f   :  { %v406_v33 = vpop.f32.mrf.mxu1 }
 0x190   :  { %258 = vst [vmem:[#allocation8 + $0x28] sm:$0xff] %v406_v33 }
 0x191   :  { %v234_v34 = vpop.f32.mrf.mxu1 }
 0x192   :  { %257 = vst [vmem:[#allocation8 + $0x20] sm:$0xff] %v234_v34 }
 0x195   :  { %v409_v35 = vpop.f32.mrf.mxu1 }
 0x196   :  { %v403_v36 = vpop.f32.mrf.mxu0  ;;  %260 = vst [vmem:[#allocation8 + $0x38] sm:$0xff] %v409_v35 }
 0x197   :  { %256 = vst [vmem:[#allocation8 + $0x18] sm:$0xff] %v403_v36  ;;  %v244_v37 = vpop.f32.mrf.mxu1 }
 0x198   :  { %v224_v38 = vpop.f32.mrf.mxu0  ;;  %259 = vst [vmem:[#allocation8 + $0x30] sm:$0xff] %v244_v37 }
 0x199   :  { %255 = vst [vmem:[#allocation8 + $0x10] sm:$0xff] %v224_v38 }
 0x19a   :  { %561 = shalt.err (!%p558_p10)
}
 0x19b   :  { %302 = dma.vmem_to_hbm [thread:$0]  %s297_s12, 1024, %s651_s3, [#allocation4], %s579_s18, %s579_s18, %s580_s19  }
 0x19c   :  { %574 = dma.done.wait [#allocation4], 1024  }
 0x19d   :  { %575 = vsyncadd [#allocation4], 4294966272 }
 0x19e   :  { %576 = dma.done.wait [#allocation10], 16  }
 0x19f   :  { %577 = vsyncadd [#allocation10], 4294967280 }
 0x1a0   :  { %319 = vsyncpa [#allocation3], 1 }
 0x1a1   :  { %320 = vsyncpa [#allocation6], 1 }
 0x1a2   :  { %321 = vsyncpa [#allocation4], 1 }
 0x1a3   :  { %322 = vsyncpa [#allocation10], 1 }

</bundles_post_ra>
